<compile_context>
chip_gen: v5e
topology: v5e:2x2
jax: 0.10.0
libtpu: 0.0.40
codegen_flags: <defaults>
</compile_context>

<pallas_src>
import math

import jax
import jax.numpy as jnp
from jax.experimental import pallas as pl
from jax.experimental.pallas import tpu as pltpu


def _round_up(x, m):
    return ((x + m - 1) // m) * m


def _vmem_limit_bytes():
    """Generation-aware scoped-VMEM limit (half of physical capacity)."""
    cap = 64 * 1024 * 1024  # conservative default (v7x per-TC VMEM)
    try:
        info = pltpu.get_tpu_info()
        cap = int(getattr(info, "vmem_capacity_bytes", cap))
    except Exception:
        pass
    # 32 MiB on 64 MiB parts (v7x), 64 MiB on 128 MiB parts (v5e/v6e).
    return min(max(cap // 2, 32 * 1024 * 1024), 64 * 1024 * 1024)


def _pack_factor(dim, out, itemsize, weight_budget):
    """Rows-per-lane-group packing factor L.

    Preference order (all capped by packed-weight VMEM residency):
      1) both Kp=L*dim and Np=L*out lane-dense (multiples of 128)
      2) output lane-dense only (stores are the biggest lever)
      3) input lane-dense only
      4) no packing
    """
    lk = 128 // math.gcd(dim, 128)   # Kp = L*dim  % 128 == 0
    ln = 128 // math.gcd(out, 128)   # Np = L*out  % 128 == 0
    for L in (math.lcm(lk, ln), ln, lk, 1):
        if (L * dim) * (L * out) * itemsize <= weight_budget:
            return L
    return 1


def _plan_row_tile(rows_p, Kp, Np, x_isz, o_isz, tmp_req, budget):
    """Packed-row tile size: as big as the VMEM budget allows, multiple of 8."""
    SUB = 8
    kp_pad = _round_up(Kp, 128)
    np_pad = _round_up(Np, 128)

    def vmem_bytes(t):
        return (2 * t * kp_pad * x_isz            # x tile, double buffered
                + 2 * t * np_pad * o_isz          # y tile, double buffered
                + _round_up(Kp, 8) * np_pad * x_isz   # weight, Buffered(1)
                + SUB * np_pad * 4)               # f32 bias, Buffered(1)

    if rows_p <= SUB:
        return rows_p                             # full extent (tiling rule ok)
    tmp = _round_up(max(1, tmp_req), SUB)
    # Let both v7x TensorCores get at least one block (no effect on 1-TC chips).
    tmp = min(tmp, _round_up(pl.cdiv(rows_p, 2), SUB))
    tmp = max(SUB, tmp)
    while tmp > SUB and vmem_bytes(tmp) > budget:
        tmp = max(SUB, _round_up(tmp // 2, SUB))
    if tmp >= rows_p:
        tmp = rows_p
    return tmp


def _head_kernel(x_ref, w_ref, b_ref, o_ref):
    # x_ref: (tmp, Kp)  packed rows x packed channels (lane-dense)
    # w_ref: (Kp, Np)   block-diagonal packed weight (VMEM-resident constant)
    # b_ref: (1,  Np)   packed bias, kept in f32
    # o_ref: (tmp, Np)  packed output (lane-dense stores)
    acc = jnp.dot(x_ref[...], w_ref[...], preferred_element_type=jnp.float32)
    o_ref[...] = (acc + b_ref[...]).astype(o_ref.dtype)


def make_prediction_head(weight, bias, *, group_size, point_dim,
                         tm=16384, io_dtype=None):
    """Build the PredictionHead forward.

    weight: (out, dim) or (out, dim, 1)  [PyTorch Conv1d layout]
    bias:   (out,)
    Returns fwd(x: (B, M, dim)) -> (B, M, group_size, point_dim).
    Packed weight/bias are built ONCE here (outside the per-call jit).
    """
    if weight.ndim == 3:              # raw Conv1d weight (out, in, k=1)
        weight = weight[:, :, 0]
    out, dim = weight.shape
    assert out == group_size * point_dim
    assert bias.shape == (out,)

    compute_dtype = jnp.dtype(io_dtype) if io_dtype is not None else jnp.dtype(weight.dtype)
    itemsize = compute_dtype.itemsize

    vmem_limit = _vmem_limit_bytes()
    tile_budget = int(vmem_limit * 0.75)          # headroom for compiler scratch
    L = _pack_factor(dim, out, itemsize, weight_budget=vmem_limit // 4)
    Kp, Np = L * dim, L * out

    # ---- one-time packing (eager, hoisted out of the jitted forward) -------
    wt = jnp.asarray(weight).T.astype(compute_dtype)          # (dim, out)
    if L == 1:
        wp = wt
    else:
        eye = jnp.eye(L, dtype=compute_dtype)
        # wp[i*dim+d, j*out+o] = eye[i,j] * wt[d,o]  (block-diagonal W^T)
        wp = jnp.einsum("ij,do->idjo", eye, wt).reshape(Kp, Np)
    bp = jnp.tile(jnp.asarray(bias).astype(jnp.float32), L).reshape(1, Np)

    @jax.jit
    def _fwd_impl(x, wp_, bp_):
        B, M, d = x.shape
        assert d == dim
        x = x.astype(compute_dtype)
        rows = B * M
        rows_pad = _round_up(rows, L)
        xf = x.reshape(rows, dim)                 # contiguous -> free reshape
        if rows_pad != rows:                      # awkward batch: pad < L rows
            xf = jnp.pad(xf, ((0, rows_pad - rows), (0, 0)))
        rows_p = rows_pad // L
        xp = xf.reshape(rows_p, Kp)               # free (row-major packing)

        tmp = _plan_row_tile(rows_p, Kp, Np, itemsize, itemsize,
                             max(1, tm // L), tile_budget)
        grid = pl.cdiv(rows_p, tmp)               # boundary block clipped by Pallas

        yp = pl.pallas_call(
            _head_kernel,
            out_shape=jax.ShapeDtypeStruct((rows_p, Np), compute_dtype),
            grid_spec=pltpu.PrefetchScalarGridSpec(
                num_scalar_prefetch=0,
                grid=(grid,),
                in_specs=[
                    pl.BlockSpec((tmp, Kp), lambda i: (i, 0)),      # x row tile
                    pl.BlockSpec((Kp, Np), lambda i: (0, 0),        # resident weight
                                 pipeline_mode=pl.Buffered(1)),
                    pl.BlockSpec((1, Np), lambda i: (0, 0),         # resident f32 bias
                                 pipeline_mode=pl.Buffered(1)),
                ],
                out_specs=pl.BlockSpec((tmp, Np), lambda i: (i, 0)),
            ),
            compiler_params=pltpu.CompilerParams(
                dimension_semantics=("parallel",),
                vmem_limit_bytes=vmem_limit,
            ),
        )(xp, wp_, bp_)

        # Packed (rows_pad//L, L*out) row-major == (rows_pad, out) row-major.
        y = yp.reshape(rows_pad, out)
        if rows_pad != rows:
            y = y[:rows]
        return y.reshape(B, M, group_size, point_dim)

    def fwd(x):
        return _fwd_impl(x, wp, bp)

    return fwd


def _init_params(key, dim, group_size, point_dim):
    out = point_dim * group_size
    # PyTorch nn.init.trunc_normal_(std=0.02) truncates at ABSOLUTE +/-2
    # (= +/-100 sigma for std=0.02), i.e. effectively an untruncated normal.
    w = 0.02 * jax.random.truncated_normal(
        key, -2.0 / 0.02, 2.0 / 0.02, (out, dim), dtype=jnp.float32
    )
    b = jnp.zeros((out,), dtype=jnp.float32)
    return w, b


if __name__ == "__main__":
    B, M, dim = 2, 64, 32
    group_size, point_dim = 4, 3

    key = jax.random.PRNGKey(0)
    kx, kw, kx2 = jax.random.split(key, 3)
    x = jax.random.normal(kx, (B, M, dim), dtype=jnp.float32)
    weight, bias = _init_params(kw, dim, group_size, point_dim)

    def reference(xx):
        Bb, Mm, _ = xx.shape
        return (jnp.einsum("bmd,od->bmo", xx, weight) + bias).reshape(
            Bb, Mm, group_size, point_dim)

    # Default (f32) path.
    head = make_prediction_head(weight, bias, group_size=group_size,
                                point_dim=point_dim)
    pred = jax.block_until_ready(head(x))
    ref = reference(x)
    assert pred.shape == (B, M, group_size, point_dim)
    assert jnp.allclose(pred, ref, atol=1e-5, rtol=1e-5)

    # Multi-block grid (grid >= 2) + rows % L != 0 padding path.
    B2, M2 = 2, 200
    x2 = jax.random.normal(kx2, (B2, M2, dim), dtype=jnp.float32)
    head_small = make_prediction_head(weight, bias, group_size=group_size,
                                      point_dim=point_dim, tm=256)
    pred2 = jax.block_until_ready(head_small(x2))
    assert jnp.allclose(pred2, reference(x2), atol=1e-5, rtol=1e-5)

    # bf16 I/O path (halves HBM traffic; bias stays f32 on the accumulator).
    head_bf16 = make_prediction_head(weight, bias, group_size=group_size,
                                     point_dim=point_dim, io_dtype=jnp.bfloat16)
    pred3 = jax.block_until_ready(head_bf16(x))
    assert jnp.allclose(pred3.astype(jnp.float32), ref, atol=5e-2, rtol=5e-2)

    print("KERNEL_OK")
</pallas_src>

<mosaic_0001>
module attributes {stable_mosaic.version = 11 : i64} {
  func.func @_head_kernel(%arg0: i32, %arg1: memref<4x1024xf32, #tpu.memory_space<vmem>>, %arg2: memref<1024x384xf32, #tpu.memory_space<vmem>>, %arg3: memref<1x384xf32, #tpu.memory_space<vmem>>, %arg4: memref<4x384xf32, #tpu.memory_space<vmem>>) attributes {dimension_semantics = [#tpu.dimension_semantics<parallel>], iteration_bounds = array<i64: 1>, scalar_prefetch = 0 : i64, scratch_operands = 0 : i64, tpu.core_type = #tpu.core_type<tc>, window_params = [{transform_indices = @transform_0, window_bounds = array<i64: 4, 1024>}, {pipeline_mode = #tpu.pipeline_mode<synchronous>, transform_indices = @transform_1, window_bounds = array<i64: 1024, 384>}, {pipeline_mode = #tpu.pipeline_mode<synchronous>, transform_indices = @transform_2, window_bounds = array<i64: 1, 384>}, {transform_indices = @transform_3, window_bounds = array<i64: 4, 384>}]} {
    %c0 = arith.constant 0 : index
    %c0_0 = arith.constant 0 : index
    %0 = vector.load %arg1[%c0, %c0_0] : memref<4x1024xf32, #tpu.memory_space<vmem>>, vector<4x1024xf32>
    %c0_1 = arith.constant 0 : index
    %c0_2 = arith.constant 0 : index
    %1 = vector.load %arg2[%c0_1, %c0_2] : memref<1024x384xf32, #tpu.memory_space<vmem>>, vector<1024x384xf32>
    %cst = arith.constant dense<0.000000e+00> : vector<4x384xf32>
    %2 = tpu.matmul %0, %1, %cst {dimension_numbers = #tpu.dot_dimension_numbers<[1], [0], [0], [1], [0, 0, 1, 1], [], []>} : vector<4x1024xf32>, vector<1024x384xf32>, vector<4x384xf32> -> vector<4x384xf32>
    %c0_3 = arith.constant 0 : index
    %c0_4 = arith.constant 0 : index
    %3 = vector.load %arg3[%c0_3, %c0_4] : memref<1x384xf32, #tpu.memory_space<vmem>>, vector<1x384xf32>
    %4 = vector.broadcast %3 : vector<1x384xf32> to vector<4x384xf32>
    %5 = arith.addf %2, %4 : vector<4x384xf32>
    %c0_5 = arith.constant 0 : index
    %c0_6 = arith.constant 0 : index
    %6 = vector.load %arg4[%c0_5, %c0_6] : memref<4x384xf32, #tpu.memory_space<vmem>>, vector<4x384xf32>
    tpu.vector_store %arg4[%c0_5, %c0_6], %5 {strides = array<i32>} : memref<4x384xf32, #tpu.memory_space<vmem>>, vector<4x384xf32>,
    return
  }
  func.func @transform_0(%arg0: i32) -> (i32, i32) {
    %c0_i32 = arith.constant 0 : i32
    %c0_i32_0 = arith.constant 0 : i32
    return %arg0, %c0_i32 : i32, i32
  }
  func.func @transform_1(%arg0: i32) -> (i32, i32) {
    %c0_i32 = arith.constant 0 : i32
    %c0_i32_0 = arith.constant 0 : i32
    %c0_i32_1 = arith.constant 0 : i32
    return %c0_i32, %c0_i32_0 : i32, i32
  }
  func.func @transform_2(%arg0: i32) -> (i32, i32) {
    %c0_i32 = arith.constant 0 : i32
    %c0_i32_0 = arith.constant 0 : i32
    %c0_i32_1 = arith.constant 0 : i32
    return %c0_i32, %c0_i32_0 : i32, i32
  }
  func.func @transform_3(%arg0: i32) -> (i32, i32) {
    %c0_i32 = arith.constant 0 : i32
    %c0_i32_0 = arith.constant 0 : i32
    return %arg0, %c0_i32 : i32, i32
  }
}

</mosaic_0001>

<bundles_post_ra>
// kernel: _fwd_impl.1
= control target key start
LH: loop header
LB: loop body
LE: loop exit
PB: predicated region body
PF: predicated region fallthrough
CT: control target
= control target key end

     0   :  { %8 = vsyncpa [#allocation3], 0  ;;  %s1105_s0 = inlined_call_operand.vmem [shape: f32[4,1024], index: 0, kind: input, shape index: {}]   ;;  %s1106_s1 = inlined_call_operand.hbm [shape: f32[1024,384], index: 1, kind: input, shape index: {}]   ;;  %s1107_s2 = inlined_call_operand.hbm [shape: f32[1,384], index: 2, kind: input, shape index: {}]   ;;  %s1108_s3 = inlined_call_operand.vmem [shape: f32[4,384], index: 3, kind: output, shape index: {}]  }
   0x1   :  { %s16_s14 = sshll.u32 %s1106_s1, 4  ;;  %s17_s14 = int_to_ptr.hbm [resolvable:$true] %s16_s14 }
   0x2   :  { %9 = vsyncpa [#allocation5], 0  ;;  %s1018_s15 = smov [#allocation2]   ;;  %s30_s19 = sshll.u32 %s1107_s2, 4  ;;  %s31_s19 = int_to_ptr.hbm [resolvable:$true] %s30_s19 }
   0x3   :  { %s18_s16 = sshll.u32 %s1018_s15, 4  ;;  %s1019_s20 = smov 384   ;;  %s19_s16 = int_to_ptr.vmem [resolvable:$true] %s18_s16 }
   0x4   :  { %s1020_s21 = smov 24   ;;  %s1021_s22 = smov [#allocation4]  }
   0x5   :  { %24 = dma.hbm_to_vmem [thread:$0]  %s17_s14, 49152, %s19_s16, [#allocation3], %s1019_s20, %s1019_s20, %s1020_s21  }
   0x6   :  { %s32_s23 = sshll.u32 %s1021_s22, 4  ;;  %s33_s23 = int_to_ptr.vmem [resolvable:$true] %s32_s23 }
   0x7   :  { %35 = dma.hbm_to_vmem [thread:$0]  %s31_s19, 48, %s33_s23, [#allocation5]  }
   0x8   :  { %1014 = dma.done.wait [#allocation3], 49152  }
   0x9   :  { %1015 = vsyncadd [#allocation3], 4294918144 }
   0xa   :  { %1016 = dma.done.wait [#allocation5], 48  }
   0xb   :  { %1017 = vsyncadd [#allocation5], 4294967248  ;;  %v189_v0 = vld [vmem:[#allocation2 + $0x468] sm:$0xff]  ;;  %v186_v2 = vld [vmem:[#allocation2 + $0x450] sm:$0xff]  ;;  %vm950_vm0 = vcmask 1043456  }
   0xc   :  { %v93_v1 = vld [vmem:[#allocation2 + $0x168] sm:$0xff]  ;;  %507 = vmatpush.msra.mxu2 %v189_v0  ;;  %v90_v4 = vld [vmem:[#allocation2 + $0x150] sm:$0xff]  ;;  %v183_v6 = vld [vmem:[#allocation2 + $0x438] sm:$0xff] }
   0xd   :  { %467 = vmatpush.msra.mxu0 %v93_v1  ;;  %v237_v3 = vld [vmem:[#allocation2 + $0x5e8] sm:$0xff]  ;;  %v234_v7 = vld [vmem:[#allocation2 + $0x5d0] sm:$0xff]  ;;  %v87_v8 = vld [vmem:[#allocation2 + $0x138] sm:$0xff] }
   0xe   :  { %v141_v5 = vld [vmem:[#allocation2 + $0x2e8] sm:$0xff]  ;;  %527 = vmatpush.msra.mxu3 %v237_v3  ;;  %508 = vmatpush.msra.mxu2 %v186_v2  ;;  %v138_v9 = vld [vmem:[#allocation2 + $0x2d0] sm:$0xff]  ;;  %v231_v10 = vld [vmem:[#allocation2 + $0x5b8] sm:$0xff] }
   0xf   :  { %487 = vmatpush.msra.mxu1 %v141_v5  ;;  %468 = vmatpush.msra.mxu0 %v90_v4  ;;  %v180_v11 = vld [vmem:[#allocation2 + $0x420] sm:$0xff]  ;;  %v135_v13 = vld [vmem:[#allocation2 + $0x2b8] sm:$0xff]  ;;  %v177_v16 = vld [vmem:[#allocation2 + $0x408] sm:$0xff] }
  0x10   :  { %528 = vmatpush.msra.mxu3 %v234_v7  ;;  %v84_v12 = vld [vmem:[#allocation2 + $0x120] sm:$0xff]  ;;  %509 = vmatpush.msra.mxu2 %v183_v6  ;;  %v81_v17 = vld [vmem:[#allocation2 + $0x108] sm:$0xff]  ;;  %v174_v20 = vld [vmem:[#allocation2 + $0x3f0] sm:$0xff] }
  0x11   :  { %488 = vmatpush.msra.mxu1 %v138_v9  ;;  %469 = vmatpush.msra.mxu0 %v87_v8  ;;  %v228_v14 = vld [vmem:[#allocation2 + $0x5a0] sm:$0xff]  ;;  %v225_v18 = vld [vmem:[#allocation2 + $0x588] sm:$0xff]  ;;  %v78_v21 = vld [vmem:[#allocation2 + $0xf0] sm:$0xff] }
  0x12   :  { %v132_v15 = vld [vmem:[#allocation2 + $0x2a0] sm:$0xff]  ;;  %529 = vmatpush.msra.mxu3 %v231_v10  ;;  %510 = vmatpush.msra.mxu2 %v180_v11  ;;  %v129_v19 = vld [vmem:[#allocation2 + $0x288] sm:$0xff]  ;;  %v222_v22 = vld [vmem:[#allocation2 + $0x570] sm:$0xff] }
  0x13   :  { %489 = vmatpush.msra.mxu1 %v135_v13  ;;  %470 = vmatpush.msra.mxu0 %v84_v12  ;;  %v126_v23 = vld [vmem:[#allocation2 + $0x270] sm:$0xff]  ;;  %v171_v24 = vld [vmem:[#allocation2 + $0x3d8] sm:$0xff]  ;;  %v168_v28 = vld [vmem:[#allocation2 + $0x3c0] sm:$0xff] }
  0x14   :  { %530 = vmatpush.msra.mxu3 %v228_v14  ;;  %511 = vmatpush.msra.mxu2 %v177_v16  ;;  %v75_v25 = vld [vmem:[#allocation2 + $0xd8] sm:$0xff]  ;;  %v72_v29 = vld [vmem:[#allocation2 + $0xc0] sm:$0xff]  ;;  %v165_v32 = vld [vmem:[#allocation2 + $0x3a8] sm:$0xff] }
  0x15   :  { %490 = vmatpush.msra.mxu1 %v132_v15  ;;  %471 = vmatpush.msra.mxu0 %v81_v17  ;;  %v219_v26 = vld [vmem:[#allocation2 + $0x558] sm:$0xff]  ;;  %v216_v30 = vld [vmem:[#allocation2 + $0x540] sm:$0xff]  ;;  %v69_v33 = vld [vmem:[#allocation2 + $0xa8] sm:$0xff] }
  0x16   :  { %531 = vmatpush.msra.mxu3 %v225_v18  ;;  %512 = vmatpush.msra.mxu2 %v174_v20  ;;  %v123_v27 = vld [vmem:[#allocation2 + $0x258] sm:$0xff]  ;;  %v120_v31 = vld [vmem:[#allocation2 + $0x240] sm:$0xff]  ;;  %v213_v34 = vld [vmem:[#allocation2 + $0x528] sm:$0xff] }
  0x17   :  { %491 = vmatpush.msra.mxu1 %v129_v19  ;;  %472 = vmatpush.msra.mxu0 %v78_v21  ;;  %v117_v35 = vld [vmem:[#allocation2 + $0x228] sm:$0xff]  ;;  %v162_v36 = vld [vmem:[#allocation2 + $0x390] sm:$0xff]  ;;  %v159_v40 = vld [vmem:[#allocation2 + $0x378] sm:$0xff] }
  0x18   :  { %532 = vmatpush.msra.mxu3 %v222_v22  ;;  %513 = vmatpush.msra.mxu2 %v171_v24  ;;  %v66_v37 = vld [vmem:[#allocation2 + $0x90] sm:$0xff]  ;;  %v63_v41 = vld [vmem:[#allocation2 + $0x78] sm:$0xff]  ;;  %v156_v44 = vld [vmem:[#allocation2 + $0x360] sm:$0xff] }
  0x19   :  { %492 = vmatpush.msra.mxu1 %v126_v23  ;;  %473 = vmatpush.msra.mxu0 %v75_v25  ;;  %v210_v38 = vld [vmem:[#allocation2 + $0x510] sm:$0xff]  ;;  %v207_v42 = vld [vmem:[#allocation2 + $0x4f8] sm:$0xff]  ;;  %v60_v45 = vld [vmem:[#allocation2 + $0x60] sm:$0xff] }
  0x1a   :  { %533 = vmatpush.msra.mxu3 %v219_v26  ;;  %514 = vmatpush.msra.mxu2 %v168_v28  ;;  %v114_v39 = vld [vmem:[#allocation2 + $0x210] sm:$0xff]  ;;  %v111_v43 = vld [vmem:[#allocation2 + $0x1f8] sm:$0xff]  ;;  %v204_v46 = vld [vmem:[#allocation2 + $0x4e0] sm:$0xff] }
  0x1b   :  { %493 = vmatpush.msra.mxu1 %v123_v27  ;;  %474 = vmatpush.msra.mxu0 %v72_v29  ;;  %v108_v47 = vld [vmem:[#allocation2 + $0x1e0] sm:$0xff]  ;;  %v153_v48 = vld [vmem:[#allocation2 + $0x348] sm:$0xff]  ;;  %v150_v52 = vld [vmem:[#allocation2 + $0x330] sm:$0xff] }
  0x1c   :  { %534 = vmatpush.msra.mxu3 %v216_v30  ;;  %515 = vmatpush.msra.mxu2 %v165_v32  ;;  %v57_v49 = vld [vmem:[#allocation2 + $0x48] sm:$0xff]  ;;  %v54_v53 = vld [vmem:[#allocation2 + $0x30] sm:$0xff]  ;;  %v147_v56 = vld [vmem:[#allocation2 + $0x318] sm:$0xff] }
  0x1d   :  { %494 = vmatpush.msra.mxu1 %v120_v31  ;;  %475 = vmatpush.msra.mxu0 %v69_v33  ;;  %v201_v50 = vld [vmem:[#allocation2 + $0x4c8] sm:$0xff]  ;;  %v198_v54 = vld [vmem:[#allocation2 + $0x4b0] sm:$0xff]  ;;  %v51_v57 = vld [vmem:[#allocation2 + $0x18] sm:$0xff] }
  0x1e   :  { %535 = vmatpush.msra.mxu3 %v213_v34  ;;  %516 = vmatpush.msra.mxu2 %v162_v36  ;;  %v105_v51 = vld [vmem:[#allocation2 + $0x1c8] sm:$0xff]  ;;  %v102_v55 = vld [vmem:[#allocation2 + $0x1b0] sm:$0xff]  ;;  %v195_v58 = vld [vmem:[#allocation2 + $0x498] sm:$0xff] }
  0x1f   :  { %495 = vmatpush.msra.mxu1 %v117_v35  ;;  %476 = vmatpush.msra.mxu0 %v66_v37  ;;  %v99_v59 = vld [vmem:[#allocation2 + $0x198] sm:$0xff]  ;;  %v144_v60 = vld [vmem:[#allocation2 + $0x300] sm:$0xff]  ;;  %v381_v62 = vld [vmem:[#allocation2 + $0xa68] sm:$0xff] }
  0x20   :  { %536 = vmatpush.msra.mxu3 %v210_v38  ;;  %517 = vmatpush.msra.mxu2 %v159_v40  ;;  %v48_v61 = vld [vmem:[#allocation2] sm:$0xff]  ;;  %v285_v0 = vld [vmem:[#allocation2 + $0x768] sm:$0xff]  ;;  %v378_v2 = vld [vmem:[#allocation2 + $0xa50] sm:$0xff] }
  0x21   :  { %496 = vmatpush.msra.mxu1 %v114_v39  ;;  %477 = vmatpush.msra.mxu0 %v63_v41  ;;  %v192_v63 = vld [vmem:[#allocation2 + $0x480] sm:$0xff]  ;;  %v429_v1 = vld [vmem:[#allocation2 + $0xbe8] sm:$0xff]  ;;  %v282_v4 = vld [vmem:[#allocation2 + $0x750] sm:$0xff] }
  0x22   :  { %537 = vmatpush.msra.mxu3 %v207_v42  ;;  %518 = vmatpush.msra.mxu2 %v156_v44  ;;  %v96_v3 = vld [vmem:[#allocation2 + $0x180] sm:$0xff]  ;;  %v333_v5 = vld [vmem:[#allocation2 + $0x8e8] sm:$0xff]  ;;  %v375_v6 = vld [vmem:[#allocation2 + $0xa38] sm:$0xff] }
  0x23   :  { %497 = vmatpush.msra.mxu1 %v111_v43  ;;  %478 = vmatpush.msra.mxu0 %v60_v45  ;;  %v426_v7 = vld [vmem:[#allocation2 + $0xbd0] sm:$0xff]  ;;  %v279_v8 = vld [vmem:[#allocation2 + $0x738] sm:$0xff]  ;;  %v372_v10 = vld [vmem:[#allocation2 + $0xa20] sm:$0xff] }
  0x24   :  { %538 = vmatpush.msra.mxu3 %v204_v46  ;;  %519 = vmatpush.msra.mxu2 %v153_v48  ;;  %v330_v9 = vld [vmem:[#allocation2 + $0x8d0] sm:$0xff]  ;;  %v423_v11 = vld [vmem:[#allocation2 + $0xbb8] sm:$0xff]  ;;  %v276_v12 = vld [vmem:[#allocation2 + $0x720] sm:$0xff] }
  0x25   :  { %498 = vmatpush.msra.mxu1 %v108_v47  ;;  %479 = vmatpush.msra.mxu0 %v57_v49  ;;  %v327_v13 = vld [vmem:[#allocation2 + $0x8b8] sm:$0xff]  ;;  %v369_v14 = vld [vmem:[#allocation2 + $0xa08] sm:$0xff]  ;;  %v420_v15 = vld [vmem:[#allocation2 + $0xba0] sm:$0xff] }
  0x26   :  { %539 = vmatpush.msra.mxu3 %v201_v50  ;;  %520 = vmatpush.msra.mxu2 %v150_v52  ;;  %v273_v16 = vld [vmem:[#allocation2 + $0x708] sm:$0xff]  ;;  %v324_v17 = vld [vmem:[#allocation2 + $0x8a0] sm:$0xff]  ;;  %v366_v18 = vld [vmem:[#allocation2 + $0x9f0] sm:$0xff] }
  0x27   :  { %499 = vmatpush.msra.mxu1 %v105_v51  ;;  %480 = vmatpush.msra.mxu0 %v54_v53  ;;  %v417_v19 = vld [vmem:[#allocation2 + $0xb88] sm:$0xff]  ;;  %v270_v20 = vld [vmem:[#allocation2 + $0x6f0] sm:$0xff]  ;;  %v363_v22 = vld [vmem:[#allocation2 + $0x9d8] sm:$0xff] }
  0x28   :  { %540 = vmatpush.msra.mxu3 %v198_v54  ;;  %521 = vmatpush.msra.mxu2 %v147_v56  ;;  %v321_v21 = vld [vmem:[#allocation2 + $0x888] sm:$0xff]  ;;  %v414_v23 = vld [vmem:[#allocation2 + $0xb70] sm:$0xff]  ;;  %v45_v24 = vld [vmem:[%s1105_s0 + $0x8] sm:$0xff] }
  0x29   :  { %500 = vmatpush.msra.mxu1 %v102_v55  ;;  %481 = vmatpush.msra.mxu0 %v51_v57  ;;  %v267_v25 = vld [vmem:[#allocation2 + $0x6d8] sm:$0xff]  ;;  %v318_v26 = vld [vmem:[#allocation2 + $0x870] sm:$0xff]  ;;  %446 = vst [vmem:[#allocation1 + $0x10] ss:$2 sm:$0xff] %v45_v24  ;;  %v360_v27 = vld [vmem:[#allocation2 + $0x9c0] sm:$0xff] }
  0x2a   :  { %541 = vmatpush.msra.mxu3 %v195_v58  ;;  %522 = vmatpush.msra.mxu2 %v144_v60  ;;  %v411_v28 = vld [vmem:[#allocation2 + $0xb58] sm:$0xff]  ;;  %v264_v30 = vld [vmem:[#allocation2 + $0x6c0] sm:$0xff]  ;;  %v357_v32 = vld [vmem:[#allocation2 + $0x9a8] sm:$0xff] }
  0x2b   :  { %501 = vmatpush.msra.mxu1 %v99_v59  ;;  %482 = vmatpush.msra.mxu0 %v48_v61  ;;  %v44_v29 = vld [vmem:[%s1105_s0] sm:$0xff]  ;;  %v408_v33 = vld [vmem:[#allocation2 + $0xb40] sm:$0xff]  ;;  %v261_v34 = vld [vmem:[#allocation2 + $0x6a8] sm:$0xff] }
  0x2c   :  { %587 = vmatpush.msrb.mxu2 %v381_v62  ;;  %542 = vmatpush.msra.mxu3 %v192_v63  ;;  %v315_v31 = vld [vmem:[#allocation2 + $0x858] sm:$0xff]  ;;  %444 = vst [vmem:[#allocation1] ss:$2 sm:$0xff] %v44_v29  ;;  %v312_v35 = vld [vmem:[#allocation2 + $0x840] sm:$0xff]  ;;  %v354_v36 = vld [vmem:[#allocation2 + $0x990] sm:$0xff] }
  0x2d   :  { %547 = vmatpush.msrb.mxu0 %v285_v0  ;;  %502 = vmatpush.msra.mxu1 %v96_v3  ;;  %v405_v37 = vld [vmem:[#allocation2 + $0xb28] sm:$0xff]  ;;  %v47_v38 = vld [vmem:[%s1105_s0 + $0x18] sm:$0xff]  ;;  %v351_v41 = vld [vmem:[#allocation2 + $0x978] sm:$0xff] }
  0x2e   :  { %607 = vmatpush.msrb.mxu3 %v429_v1  ;;  %588 = vmatpush.msrb.mxu2 %v378_v2  ;;  %v258_v39 = vld [vmem:[#allocation2 + $0x690] sm:$0xff]  ;;  %v309_v40 = vld [vmem:[#allocation2 + $0x828] sm:$0xff]  ;;  %450 = vst [vmem:[#allocation1 + $0x30] ss:$2 sm:$0xff] %v47_v38  ;;  %v255_v43 = vld [vmem:[#allocation2 + $0x678] sm:$0xff] }
  0x2f   :  { %548 = vmatpush.msrb.mxu0 %v282_v4  ;;  %567 = vmatpush.msrb.mxu1 %v333_v5  ;;  %v402_v42 = vld [vmem:[#allocation2 + $0xb10] sm:$0xff]  ;;  %v46_v45 = vld [vmem:[%s1105_s0 + $0x10] sm:$0xff]  ;;  %v348_v46 = vld [vmem:[#allocation2 + $0x960] sm:$0xff] }
  0x30   :  { %589 = vmatpush.msrb.mxu2 %v375_v6  ;;  %608 = vmatpush.msrb.mxu3 %v426_v7  ;;  %v306_v44 = vld [vmem:[#allocation2 + $0x810] sm:$0xff]  ;;  %v399_v47 = vld [vmem:[#allocation2 + $0xaf8] sm:$0xff]  ;;  %v252_v48 = vld [vmem:[#allocation2 + $0x660] sm:$0xff]  ;;  %448 = vst [vmem:[#allocation1 + $0x20] ss:$2 sm:$0xff] %v46_v45 }
  0x31   :  { %549 = vmatpush.msrb.mxu0 %v279_v8  ;;  %568 = vmatpush.msrb.mxu1 %v330_v9  ;;  %v303_v49 = vld [vmem:[#allocation2 + $0x7f8] sm:$0xff]  ;;  %v345_v50 = vld [vmem:[#allocation2 + $0x948] sm:$0xff]  ;;  %v396_v51 = vld [vmem:[#allocation2 + $0xae0] sm:$0xff] }
  0x32   :  { %590 = vmatpush.msrb.mxu2 %v372_v10  ;;  %609 = vmatpush.msrb.mxu3 %v423_v11  ;;  %v249_v52 = vld [vmem:[#allocation2 + $0x648] sm:$0xff]  ;;  %v300_v53 = vld [vmem:[#allocation2 + $0x7e0] sm:$0xff]  ;;  %v342_v54 = vld [vmem:[#allocation2 + $0x930] sm:$0xff] }
  0x33   :  { %550 = vmatpush.msrb.mxu0 %v276_v12  ;;  %569 = vmatpush.msrb.mxu1 %v327_v13  ;;  %v393_v55 = vld [vmem:[#allocation2 + $0xac8] sm:$0xff]  ;;  %v246_v56 = vld [vmem:[#allocation2 + $0x630] sm:$0xff]  ;;  %v339_v58 = vld [vmem:[#allocation2 + $0x918] sm:$0xff] }
  0x34   :  { %591 = vmatpush.msrb.mxu2 %v369_v14  ;;  %610 = vmatpush.msrb.mxu3 %v420_v15  ;;  %v297_v57 = vld [vmem:[#allocation2 + $0x7c8] sm:$0xff]  ;;  %v390_v59 = vld [vmem:[#allocation2 + $0xab0] sm:$0xff]  ;;  %v243_v60 = vld [vmem:[#allocation2 + $0x618] sm:$0xff] }
  0x35   :  { %551 = vmatpush.msrb.mxu0 %v273_v16  ;;  %570 = vmatpush.msrb.mxu1 %v324_v17  ;;  %v294_v61 = vld [vmem:[#allocation2 + $0x7b0] sm:$0xff]  ;;  %v336_v62 = vld [vmem:[#allocation2 + $0x900] sm:$0xff]  ;;  %v387_v63 = vld [vmem:[#allocation2 + $0xa98] sm:$0xff] }
  0x36   :  { %592 = vmatpush.msrb.mxu2 %v366_v18  ;;  %611 = vmatpush.msrb.mxu3 %v417_v19  ;;  %v1060_v0 = vld.sshfl [vmem:[#allocation1 + $0x10] sm:$0xff pattern:$0x75316420]  ;;  %v240_v1 = vld [vmem:[#allocation2 + $0x600] sm:$0xff]  ;;  %v190_v2 = vld [vmem:[#allocation2 + $0x470] sm:$0xff] }
  0x37   :  { %552 = vmatpush.msrb.mxu0 %v270_v20  ;;  %571 = vmatpush.msrb.mxu1 %v321_v21  ;;  %v291_v3 = vld [vmem:[#allocation2 + $0x798] sm:$0xff]  ;;  %v384_v4 = vld [vmem:[#allocation2 + $0xa80] sm:$0xff]  ;;  %v1065_v6 = vld.sshfl [vmem:[#allocation1 + $0x18] sm:$0xff pattern:$0x75316420] }
  0x38   :  { %593 = vmatpush.msrb.mxu2 %v363_v22  ;;  %612 = vmatpush.msrb.mxu3 %v414_v23  ;;  %v1062_v5 = vld.sshfl [vmem:[#allocation1] sm:$0xff pattern:$0x75316420]  ;;  %v94_v7 = vld [vmem:[#allocation2 + $0x170] sm:$0xff]  ;;  %v288_v10 = vld [vmem:[#allocation2 + $0x780] sm:$0xff] }
  0x39   :  { %553 = vmatpush.msrb.mxu0 %v267_v25  ;;  %572 = vmatpush.msrb.mxu1 %v318_v26  ;;  %v187_v8 = vld [vmem:[#allocation2 + $0x458] sm:$0xff]  ;;  %v238_v9 = vld [vmem:[#allocation2 + $0x5f0] sm:$0xff]  ;;  %v1069_v12 = vld.sshfl [vmem:[#allocation1 + $0x8] sm:$0xff pattern:$0x75316420] }
  0x3a   :  { %594 = vmatpush.msrb.mxu2 %v360_v27  ;;  %613 = vmatpush.msrb.mxu3 %v411_v28  ;;  %v91_v11 = vld [vmem:[#allocation2 + $0x158] sm:$0xff]  ;;  %v184_v13 = vld [vmem:[#allocation2 + $0x440] sm:$0xff]  ;;  %v142_v14 = vld [vmem:[#allocation2 + $0x2f0] sm:$0xff] }
  0x3b   :  { %554 = vmatpush.msrb.mxu0 %v264_v30  ;;  %573 = vmatpush.msrb.mxu1 %v315_v31  ;;  %v235_v15 = vld [vmem:[#allocation2 + $0x5d8] sm:$0xff]  ;;  %v88_v16 = vld [vmem:[#allocation2 + $0x140] sm:$0xff]  ;;  %v181_v17 = vld [vmem:[#allocation2 + $0x428] sm:$0xff] }
  0x3c   :  { %595 = vmatpush.msrb.mxu2 %v357_v32  ;;  %614 = vmatpush.msrb.mxu3 %v408_v33  ;;  %v139_v18 = vld [vmem:[#allocation2 + $0x2d8] sm:$0xff]  ;;  %v232_v19 = vld [vmem:[#allocation2 + $0x5c0] sm:$0xff]  ;;  %v1072_v20 = vld.sshfl [vmem:[#allocation1 + $0x30] sm:$0xff pattern:$0x75316420] }
  0x3d   :  { %555 = vmatpush.msrb.mxu0 %v261_v34  ;;  %574 = vmatpush.msrb.mxu1 %v312_v35  ;;  %v85_v21 = vld [vmem:[#allocation2 + $0x128] sm:$0xff]  ;;  %v136_v22 = vld [vmem:[#allocation2 + $0x2c0] sm:$0xff]  ;;  %v178_v23 = vld [vmem:[#allocation2 + $0x410] sm:$0xff] }
  0x3e   :  { %596 = vmatpush.msrb.mxu2 %v354_v36  ;;  %615 = vmatpush.msrb.mxu3 %v405_v37  ;;  %v229_v24 = vld [vmem:[#allocation2 + $0x5a8] sm:$0xff]  ;;  %v1074_v25 = vld.sshfl [vmem:[#allocation1 + $0x20] sm:$0xff pattern:$0x75316420]  ;;  %v82_v27 = vld [vmem:[#allocation2 + $0x110] sm:$0xff] }
  0x3f   :  { %556 = vmatpush.msrb.mxu0 %v258_v39  ;;  %575 = vmatpush.msrb.mxu1 %v309_v40  ;;  %v1077_v26 = vld.sshfl [vmem:[#allocation1 + $0x38] sm:$0xff pattern:$0x75316420]  ;;  %v133_v28 = vld [vmem:[#allocation2 + $0x2a8] sm:$0xff]  ;;  %v175_v29 = vld [vmem:[#allocation2 + $0x3f8] sm:$0xff] }
  0x40   :  { %597 = vmatpush.msrb.mxu2 %v351_v41  ;;  %616 = vmatpush.msrb.mxu3 %v402_v42  ;;  %v226_v30 = vld [vmem:[#allocation2 + $0x590] sm:$0xff]  ;;  %v1080_v31 = vld.sshfl [vmem:[#allocation1 + $0x28] sm:$0xff pattern:$0x75316420]  ;;  %v79_v32 = vld [vmem:[#allocation2 + $0xf8] sm:$0xff] }
  0x41   :  { %557 = vmatpush.msrb.mxu0 %v255_v43  ;;  %576 = vmatpush.msrb.mxu1 %v306_v44  ;;  %v130_v33 = vld [vmem:[#allocation2 + $0x290] sm:$0xff]  ;;  %v172_v34 = vld [vmem:[#allocation2 + $0x3e0] sm:$0xff]  ;;  %v223_v35 = vld [vmem:[#allocation2 + $0x578] sm:$0xff] }
  0x42   :  { %598 = vmatpush.msrb.mxu2 %v348_v46  ;;  %617 = vmatpush.msrb.mxu3 %v399_v47  ;;  %v76_v36 = vld [vmem:[#allocation2 + $0xe0] sm:$0xff]  ;;  %v127_v37 = vld [vmem:[#allocation2 + $0x278] sm:$0xff]  ;;  %v169_v38 = vld [vmem:[#allocation2 + $0x3c8] sm:$0xff] }
  0x43   :  { %558 = vmatpush.msrb.mxu0 %v252_v48  ;;  %577 = vmatpush.msrb.mxu1 %v303_v49  ;;  %v220_v39 = vld [vmem:[#allocation2 + $0x560] sm:$0xff]  ;;  %v73_v40 = vld [vmem:[#allocation2 + $0xc8] sm:$0xff]  ;;  %v166_v42 = vld [vmem:[#allocation2 + $0x3b0] sm:$0xff] }
  0x44   :  { %599 = vmatpush.msrb.mxu2 %v345_v50  ;;  %618 = vmatpush.msrb.mxu3 %v396_v51  ;;  %v124_v41 = vld [vmem:[#allocation2 + $0x260] sm:$0xff]  ;;  %v217_v43 = vld [vmem:[#allocation2 + $0x548] sm:$0xff]  ;;  %v70_v44 = vld [vmem:[#allocation2 + $0xb0] sm:$0xff] }
  0x45   :  { %559 = vmatpush.msrb.mxu0 %v249_v52  ;;  %578 = vmatpush.msrb.mxu1 %v300_v53  ;;  %v121_v45 = vld [vmem:[#allocation2 + $0x248] sm:$0xff]  ;;  %v163_v46 = vld [vmem:[#allocation2 + $0x398] sm:$0xff]  ;;  %v214_v47 = vld [vmem:[#allocation2 + $0x530] sm:$0xff] }
  0x46   :  { %600 = vmatpush.msrb.mxu2 %v342_v54  ;;  %619 = vmatpush.msrb.mxu3 %v393_v55  ;;  %v67_v48 = vld [vmem:[#allocation2 + $0x98] sm:$0xff]  ;;  %v118_v49 = vld [vmem:[#allocation2 + $0x230] sm:$0xff]  ;;  %v160_v50 = vld [vmem:[#allocation2 + $0x380] sm:$0xff] }
  0x47   :  { %560 = vmatpush.msrb.mxu0 %v246_v56  ;;  %579 = vmatpush.msrb.mxu1 %v297_v57  ;;  %v211_v51 = vld [vmem:[#allocation2 + $0x518] sm:$0xff]  ;;  %v64_v52 = vld [vmem:[#allocation2 + $0x80] sm:$0xff]  ;;  %v157_v54 = vld [vmem:[#allocation2 + $0x368] sm:$0xff] }
  0x48   :  { %601 = vmatpush.msrb.mxu2 %v339_v58  ;;  %620 = vmatpush.msrb.mxu3 %v390_v59  ;;  %v115_v53 = vld [vmem:[#allocation2 + $0x218] sm:$0xff]  ;;  %v208_v55 = vld [vmem:[#allocation2 + $0x500] sm:$0xff]  ;;  %v61_v56 = vld [vmem:[#allocation2 + $0x68] sm:$0xff] }
  0x49   :  { %561 = vmatpush.msrb.mxu0 %v243_v60  ;;  %580 = vmatpush.msrb.mxu1 %v294_v61  ;;  %v112_v57 = vld [vmem:[#allocation2 + $0x200] sm:$0xff]  ;;  %v154_v58 = vld [vmem:[#allocation2 + $0x350] sm:$0xff]  ;;  %v205_v59 = vld [vmem:[#allocation2 + $0x4e8] sm:$0xff] }
  0x4a   :  { %602 = vmatpush.msrb.mxu2 %v336_v62  ;;  %621 = vmatpush.msrb.mxu3 %v387_v63  ;;  %v58_v60 = vld [vmem:[#allocation2 + $0x50] sm:$0xff]  ;;  %v109_v61 = vld [vmem:[#allocation2 + $0x1e8] sm:$0xff]  ;;  %v151_v62 = vld [vmem:[#allocation2 + $0x338] sm:$0xff] }
  0x4b   :  { %523 = vmatmul.f32.vlgmr.msra.gmra.mxu2 %v1060_v0  ;;  %562 = vmatpush.msrb.mxu0 %v240_v1  ;;  %v202_v63 = vld [vmem:[#allocation2 + $0x4d0] sm:$0xff]  ;;  %v55_v1 = vld [vmem:[#allocation2 + $0x38] sm:$0xff] }
  0x4c   :  { %667 = vmatpush.msra.mxu2 %v190_v2  ;;  %581 = vmatpush.msrb.mxu1 %v291_v3  ;;  %v106_v2 = vld [vmem:[#allocation2 + $0x1d0] sm:$0xff]  ;;  %v148_v3 = vld [vmem:[#allocation2 + $0x320] sm:$0xff] }
  0x4d   :  { %622 = vmatpush.msrb.mxu3 %v384_v4  ;;  %483 = vmatmul.f32.vlgmr.msra.gmra.mxu0 %v1062_v5  ;;  %v199_v4 = vld [vmem:[#allocation2 + $0x4b8] sm:$0xff] }
  0x4e   :  { %543 = vmatmul.f32.vlgmr.msra.gmra.mxu3 %v1065_v6  ;;  %627 = vmatpush.msra.mxu0 %v94_v7  ;;  %v52_v7 = vld [vmem:[#allocation2 + $0x20] sm:$0xff] }
  0x4f   :  { %668 = vmatpush.msra.mxu2 %v187_v8  ;;  %687 = vmatpush.msra.mxu3 %v238_v9  ;;  %v103_v8 = vld [vmem:[#allocation2 + $0x1b8] sm:$0xff]  ;;  %v145_v9 = vld [vmem:[#allocation2 + $0x308] sm:$0xff] }
  0x50   :  { %582 = vmatpush.msrb.mxu1 %v288_v10  ;;  %628 = vmatpush.msra.mxu0 %v91_v11  ;;  %v196_v10 = vld [vmem:[#allocation2 + $0x4a0] sm:$0xff]  ;;  %v382_v11 = vld [vmem:[#allocation2 + $0xa70] sm:$0xff] }
  0x51   :  { %503 = vmatmul.f32.vlgmr.msra.gmra.mxu1 %v1069_v12  ;;  %669 = vmatpush.msra.mxu2 %v184_v13  ;;  %v49_v13 = vld [vmem:[#allocation2 + $0x8] sm:$0xff] }
  0x52   :  { %647 = vmatpush.msra.mxu1 %v142_v14  ;;  %688 = vmatpush.msra.mxu3 %v235_v15  ;;  %v100_v14 = vld [vmem:[#allocation2 + $0x1a0] sm:$0xff]  ;;  %v193_v15 = vld [vmem:[#allocation2 + $0x488] sm:$0xff] }
  0x53   :  { %629 = vmatpush.msra.mxu0 %v88_v16  ;;  %670 = vmatpush.msra.mxu2 %v181_v17  ;;  %v286_v16 = vld [vmem:[#allocation2 + $0x770] sm:$0xff]  ;;  %v379_v17 = vld [vmem:[#allocation2 + $0xa58] sm:$0xff] }
  0x54   :  { %648 = vmatpush.msra.mxu1 %v139_v18  ;;  %689 = vmatpush.msra.mxu3 %v232_v19  ;;  %v430_v18 = vld [vmem:[#allocation2 + $0xbf0] sm:$0xff]  ;;  %v97_v19 = vld [vmem:[#allocation2 + $0x188] sm:$0xff] }
  0x55   :  { %603 = vmatmul.f32.vlgmr.msrb.gmra.mxu2 %v1072_v20  ;;  %630 = vmatpush.msra.mxu0 %v85_v21  ;;  %v283_v21 = vld [vmem:[#allocation2 + $0x758] sm:$0xff] }
  0x56   :  { %649 = vmatpush.msra.mxu1 %v136_v22  ;;  %671 = vmatpush.msra.mxu2 %v178_v23  ;;  %v334_v22 = vld [vmem:[#allocation2 + $0x8f0] sm:$0xff]  ;;  %v376_v23 = vld [vmem:[#allocation2 + $0xa40] sm:$0xff] }
  0x57   :  { %690 = vmatpush.msra.mxu3 %v229_v24  ;;  %563 = vmatmul.f32.vlgmr.msrb.gmra.mxu0 %v1074_v25  ;;  %v427_v24 = vld [vmem:[#allocation2 + $0xbd8] sm:$0xff] }
  0x58   :  { %623 = vmatmul.f32.vlgmr.msrb.gmra.mxu3 %v1077_v26  ;;  %631 = vmatpush.msra.mxu0 %v82_v27  ;;  %v280_v27 = vld [vmem:[#allocation2 + $0x740] sm:$0xff] }
  0x59   :  { %650 = vmatpush.msra.mxu1 %v133_v28  ;;  %672 = vmatpush.msra.mxu2 %v175_v29  ;;  %v331_v28 = vld [vmem:[#allocation2 + $0x8d8] sm:$0xff]  ;;  %v373_v29 = vld [vmem:[#allocation2 + $0xa28] sm:$0xff] }
  0x5a   :  { %691 = vmatpush.msra.mxu3 %v226_v30  ;;  %583 = vmatmul.f32.vlgmr.msrb.gmra.mxu1 %v1080_v31  ;;  %v424_v30 = vld [vmem:[#allocation2 + $0xbc0] sm:$0xff] }
  0x5b   :  { %632 = vmatpush.msra.mxu0 %v79_v32  ;;  %651 = vmatpush.msra.mxu1 %v130_v33  ;;  %v277_v32 = vld [vmem:[#allocation2 + $0x728] sm:$0xff]  ;;  %v328_v33 = vld [vmem:[#allocation2 + $0x8c0] sm:$0xff] }
  0x5c   :  { %673 = vmatpush.msra.mxu2 %v172_v34  ;;  %692 = vmatpush.msra.mxu3 %v223_v35  ;;  %v370_v34 = vld [vmem:[#allocation2 + $0xa10] sm:$0xff]  ;;  %v421_v35 = vld [vmem:[#allocation2 + $0xba8] sm:$0xff] }
  0x5d   :  { %633 = vmatpush.msra.mxu0 %v76_v36  ;;  %652 = vmatpush.msra.mxu1 %v127_v37  ;;  %v274_v36 = vld [vmem:[#allocation2 + $0x710] sm:$0xff]  ;;  %v325_v37 = vld [vmem:[#allocation2 + $0x8a8] sm:$0xff] }
  0x5e   :  { %674 = vmatpush.msra.mxu2 %v169_v38  ;;  %693 = vmatpush.msra.mxu3 %v220_v39  ;;  %v367_v38 = vld [vmem:[#allocation2 + $0x9f8] sm:$0xff]  ;;  %v418_v39 = vld [vmem:[#allocation2 + $0xb90] sm:$0xff] }
  0x5f   :  { %634 = vmatpush.msra.mxu0 %v73_v40  ;;  %653 = vmatpush.msra.mxu1 %v124_v41  ;;  %v271_v40 = vld [vmem:[#allocation2 + $0x6f8] sm:$0xff]  ;;  %v322_v41 = vld [vmem:[#allocation2 + $0x890] sm:$0xff] }
  0x60   :  { %675 = vmatpush.msra.mxu2 %v166_v42  ;;  %694 = vmatpush.msra.mxu3 %v217_v43  ;;  %v364_v42 = vld [vmem:[#allocation2 + $0x9e0] sm:$0xff]  ;;  %v415_v43 = vld [vmem:[#allocation2 + $0xb78] sm:$0xff] }
  0x61   :  { %635 = vmatpush.msra.mxu0 %v70_v44  ;;  %654 = vmatpush.msra.mxu1 %v121_v45  ;;  %v268_v44 = vld [vmem:[#allocation2 + $0x6e0] sm:$0xff]  ;;  %v319_v45 = vld [vmem:[#allocation2 + $0x878] sm:$0xff] }
  0x62   :  { %676 = vmatpush.msra.mxu2 %v163_v46  ;;  %695 = vmatpush.msra.mxu3 %v214_v47  ;;  %v361_v46 = vld [vmem:[#allocation2 + $0x9c8] sm:$0xff]  ;;  %v412_v47 = vld [vmem:[#allocation2 + $0xb60] sm:$0xff] }
  0x63   :  { %636 = vmatpush.msra.mxu0 %v67_v48  ;;  %655 = vmatpush.msra.mxu1 %v118_v49  ;;  %v265_v48 = vld [vmem:[#allocation2 + $0x6c8] sm:$0xff]  ;;  %v316_v49 = vld [vmem:[#allocation2 + $0x860] sm:$0xff] }
  0x64   :  { %677 = vmatpush.msra.mxu2 %v160_v50  ;;  %696 = vmatpush.msra.mxu3 %v211_v51  ;;  %v358_v50 = vld [vmem:[#allocation2 + $0x9b0] sm:$0xff]  ;;  %v409_v51 = vld [vmem:[#allocation2 + $0xb48] sm:$0xff] }
  0x65   :  { %637 = vmatpush.msra.mxu0 %v64_v52  ;;  %656 = vmatpush.msra.mxu1 %v115_v53  ;;  %v262_v52 = vld [vmem:[#allocation2 + $0x6b0] sm:$0xff]  ;;  %v313_v53 = vld [vmem:[#allocation2 + $0x848] sm:$0xff] }
  0x66   :  { %678 = vmatpush.msra.mxu2 %v157_v54  ;;  %697 = vmatpush.msra.mxu3 %v208_v55  ;;  %v355_v54 = vld [vmem:[#allocation2 + $0x998] sm:$0xff]  ;;  %v406_v55 = vld [vmem:[#allocation2 + $0xb30] sm:$0xff] }
  0x67   :  { %638 = vmatpush.msra.mxu0 %v61_v56  ;;  %657 = vmatpush.msra.mxu1 %v112_v57  ;;  %v259_v56 = vld [vmem:[#allocation2 + $0x698] sm:$0xff]  ;;  %v310_v57 = vld [vmem:[#allocation2 + $0x830] sm:$0xff] }
  0x68   :  { %679 = vmatpush.msra.mxu2 %v154_v58  ;;  %698 = vmatpush.msra.mxu3 %v205_v59  ;;  %v352_v58 = vld [vmem:[#allocation2 + $0x980] sm:$0xff]  ;;  %v403_v59 = vld [vmem:[#allocation2 + $0xb18] sm:$0xff] }
  0x69   :  { %639 = vmatpush.msra.mxu0 %v58_v60  ;;  %658 = vmatpush.msra.mxu1 %v109_v61  ;;  %v256_v60 = vld [vmem:[#allocation2 + $0x680] sm:$0xff]  ;;  %v307_v61 = vld [vmem:[#allocation2 + $0x818] sm:$0xff] }
  0x6a   :  { %680 = vmatpush.msra.mxu2 %v151_v62  ;;  %699 = vmatpush.msra.mxu3 %v202_v63  ;;  %v349_v62 = vld [vmem:[#allocation2 + $0x968] sm:$0xff]  ;;  %v400_v63 = vld [vmem:[#allocation2 + $0xb00] sm:$0xff] }
  0x6b   :  { %640 = vmatpush.msra.mxu0 %v55_v1  ;;  %659 = vmatpush.msra.mxu1 %v106_v2  ;;  %v253_v1 = vld [vmem:[#allocation2 + $0x668] sm:$0xff]  ;;  %v304_v2 = vld [vmem:[#allocation2 + $0x800] sm:$0xff] }
  0x6c   :  { %681 = vmatpush.msra.mxu2 %v148_v3  ;;  %700 = vmatpush.msra.mxu3 %v199_v4  ;;  %v346_v3 = vld [vmem:[#allocation2 + $0x950] sm:$0xff]  ;;  %v397_v4 = vld [vmem:[#allocation2 + $0xae8] sm:$0xff] }
  0x6d   :  { %641 = vmatpush.msra.mxu0 %v52_v7  ;;  %660 = vmatpush.msra.mxu1 %v103_v8  ;;  %v250_v7 = vld [vmem:[#allocation2 + $0x650] sm:$0xff]  ;;  %v301_v8 = vld [vmem:[#allocation2 + $0x7e8] sm:$0xff] }
  0x6e   :  { %682 = vmatpush.msra.mxu2 %v145_v9  ;;  %701 = vmatpush.msra.mxu3 %v196_v10  ;;  %v343_v9 = vld [vmem:[#allocation2 + $0x938] sm:$0xff]  ;;  %v394_v10 = vld [vmem:[#allocation2 + $0xad0] sm:$0xff] }
  0x6f   :  { %642 = vmatpush.msra.mxu0 %v49_v13  ;;  %661 = vmatpush.msra.mxu1 %v100_v14  ;;  %v298_v13 = vld [vmem:[#allocation2 + $0x7d0] sm:$0xff]  ;;  %v340_v14 = vld [vmem:[#allocation2 + $0x920] sm:$0xff] }
  0x70   :  { %747 = vmatpush.msrb.mxu2 %v382_v11  ;;  %702 = vmatpush.msra.mxu3 %v193_v15  ;;  %v247_v11 = vld [vmem:[#allocation2 + $0x638] sm:$0xff] }
  0x71   :  { %707 = vmatpush.msrb.mxu0 %v286_v16  ;;  %662 = vmatpush.msra.mxu1 %v97_v19  ;;  %v391_v15 = vld [vmem:[#allocation2 + $0xab8] sm:$0xff]  ;;  %v241_v19 = vld [vmem:[#allocation2 + $0x608] sm:$0xff] }
  0x72   :  { %748 = vmatpush.msrb.mxu2 %v379_v17  ;;  %767 = vmatpush.msrb.mxu3 %v430_v18  ;;  %v295_v16 = vld [vmem:[#allocation2 + $0x7b8] sm:$0xff]  ;;  %v337_v17 = vld [vmem:[#allocation2 + $0x908] sm:$0xff]  ;;  %v388_v18 = vld [vmem:[#allocation2 + $0xaa0] sm:$0xff] }
  0x73   :  { %708 = vmatpush.msrb.mxu0 %v283_v21  ;;  %727 = vmatpush.msrb.mxu1 %v334_v22  ;;  %v191_v21 = vld [vmem:[#allocation2 + $0x478] sm:$0xff]  ;;  %v292_v22 = vld [vmem:[#allocation2 + $0x7a0] sm:$0xff] }
  0x74   :  { %749 = vmatpush.msrb.mxu2 %v376_v23  ;;  %768 = vmatpush.msrb.mxu3 %v427_v24  ;;  %v385_v23 = vld [vmem:[#allocation2 + $0xa88] sm:$0xff]  ;;  %v95_v24 = vld [vmem:[#allocation2 + $0x178] sm:$0xff] }
  0x75   :  { %709 = vmatpush.msrb.mxu0 %v280_v27  ;;  %728 = vmatpush.msrb.mxu1 %v331_v28  ;;  %v188_v27 = vld [vmem:[#allocation2 + $0x460] sm:$0xff]  ;;  %v239_v28 = vld [vmem:[#allocation2 + $0x5f8] sm:$0xff] }
  0x76   :  { %750 = vmatpush.msrb.mxu2 %v373_v29  ;;  %769 = vmatpush.msrb.mxu3 %v424_v30  ;;  %v289_v29 = vld [vmem:[#allocation2 + $0x788] sm:$0xff]  ;;  %v92_v30 = vld [vmem:[#allocation2 + $0x160] sm:$0xff] }
  0x77   :  { %710 = vmatpush.msrb.mxu0 %v277_v32  ;;  %729 = vmatpush.msrb.mxu1 %v328_v33  ;;  %v185_v32 = vld [vmem:[#allocation2 + $0x448] sm:$0xff]  ;;  %v143_v33 = vld [vmem:[#allocation2 + $0x2f8] sm:$0xff] }
  0x78   :  { %751 = vmatpush.msrb.mxu2 %v370_v34  ;;  %770 = vmatpush.msrb.mxu3 %v421_v35  ;;  %v236_v34 = vld [vmem:[#allocation2 + $0x5e0] sm:$0xff]  ;;  %v89_v35 = vld [vmem:[#allocation2 + $0x148] sm:$0xff] }
  0x79   :  { %711 = vmatpush.msrb.mxu0 %v274_v36  ;;  %730 = vmatpush.msrb.mxu1 %v325_v37  ;;  %v182_v36 = vld [vmem:[#allocation2 + $0x430] sm:$0xff]  ;;  %v140_v37 = vld [vmem:[#allocation2 + $0x2e0] sm:$0xff] }
  0x7a   :  { %752 = vmatpush.msrb.mxu2 %v367_v38  ;;  %771 = vmatpush.msrb.mxu3 %v418_v39  ;;  %v233_v38 = vld [vmem:[#allocation2 + $0x5c8] sm:$0xff]  ;;  %v86_v39 = vld [vmem:[#allocation2 + $0x130] sm:$0xff] }
  0x7b   :  { %712 = vmatpush.msrb.mxu0 %v271_v40  ;;  %731 = vmatpush.msrb.mxu1 %v322_v41  ;;  %v179_v40 = vld [vmem:[#allocation2 + $0x418] sm:$0xff]  ;;  %v137_v41 = vld [vmem:[#allocation2 + $0x2c8] sm:$0xff] }
  0x7c   :  { %753 = vmatpush.msrb.mxu2 %v364_v42  ;;  %772 = vmatpush.msrb.mxu3 %v415_v43  ;;  %v230_v42 = vld [vmem:[#allocation2 + $0x5b0] sm:$0xff]  ;;  %v83_v43 = vld [vmem:[#allocation2 + $0x118] sm:$0xff] }
  0x7d   :  { %713 = vmatpush.msrb.mxu0 %v268_v44  ;;  %732 = vmatpush.msrb.mxu1 %v319_v45  ;;  %v176_v44 = vld [vmem:[#allocation2 + $0x400] sm:$0xff]  ;;  %v134_v45 = vld [vmem:[#allocation2 + $0x2b0] sm:$0xff] }
  0x7e   :  { %754 = vmatpush.msrb.mxu2 %v361_v46  ;;  %773 = vmatpush.msrb.mxu3 %v412_v47  ;;  %v227_v46 = vld [vmem:[#allocation2 + $0x598] sm:$0xff]  ;;  %v80_v47 = vld [vmem:[#allocation2 + $0x100] sm:$0xff] }
  0x7f   :  { %714 = vmatpush.msrb.mxu0 %v265_v48  ;;  %733 = vmatpush.msrb.mxu1 %v316_v49  ;;  %v173_v48 = vld [vmem:[#allocation2 + $0x3e8] sm:$0xff]  ;;  %v131_v49 = vld [vmem:[#allocation2 + $0x298] sm:$0xff] }
  0x80   :  { %755 = vmatpush.msrb.mxu2 %v358_v50  ;;  %774 = vmatpush.msrb.mxu3 %v409_v51  ;;  %v224_v50 = vld [vmem:[#allocation2 + $0x580] sm:$0xff]  ;;  %v77_v51 = vld [vmem:[#allocation2 + $0xe8] sm:$0xff] }
  0x81   :  { %715 = vmatpush.msrb.mxu0 %v262_v52  ;;  %734 = vmatpush.msrb.mxu1 %v313_v53  ;;  %v170_v52 = vld [vmem:[#allocation2 + $0x3d0] sm:$0xff]  ;;  %v128_v53 = vld [vmem:[#allocation2 + $0x280] sm:$0xff] }
  0x82   :  { %756 = vmatpush.msrb.mxu2 %v355_v54  ;;  %775 = vmatpush.msrb.mxu3 %v406_v55  ;;  %v221_v54 = vld [vmem:[#allocation2 + $0x568] sm:$0xff]  ;;  %v74_v55 = vld [vmem:[#allocation2 + $0xd0] sm:$0xff] }
  0x83   :  { %716 = vmatpush.msrb.mxu0 %v259_v56  ;;  %735 = vmatpush.msrb.mxu1 %v310_v57  ;;  %v167_v56 = vld [vmem:[#allocation2 + $0x3b8] sm:$0xff]  ;;  %v125_v57 = vld [vmem:[#allocation2 + $0x268] sm:$0xff] }
  0x84   :  { %757 = vmatpush.msrb.mxu2 %v352_v58  ;;  %776 = vmatpush.msrb.mxu3 %v403_v59  ;;  %v218_v58 = vld [vmem:[#allocation2 + $0x550] sm:$0xff]  ;;  %v71_v59 = vld [vmem:[#allocation2 + $0xb8] sm:$0xff] }
  0x85   :  { %717 = vmatpush.msrb.mxu0 %v256_v60  ;;  %736 = vmatpush.msrb.mxu1 %v307_v61  ;;  %v164_v60 = vld [vmem:[#allocation2 + $0x3a0] sm:$0xff]  ;;  %v122_v61 = vld [vmem:[#allocation2 + $0x250] sm:$0xff] }
  0x86   :  { %758 = vmatpush.msrb.mxu2 %v349_v62  ;;  %777 = vmatpush.msrb.mxu3 %v400_v63  ;;  %v215_v62 = vld [vmem:[#allocation2 + $0x538] sm:$0xff]  ;;  %v68_v63 = vld [vmem:[#allocation2 + $0xa0] sm:$0xff] }
  0x87   :  { %683 = vmatmul.f32.vlgmr.msra.gmra.mxu2 %v1060_v0  ;;  %718 = vmatpush.msrb.mxu0 %v253_v1  ;;  %v244_v0 = vld [vmem:[#allocation2 + $0x620] sm:$0xff]  ;;  %v161_v1 = vld [vmem:[#allocation2 + $0x388] sm:$0xff] }
  0x88   :  { %737 = vmatpush.msrb.mxu1 %v304_v2  ;;  %759 = vmatpush.msrb.mxu2 %v346_v3  ;;  %v119_v2 = vld [vmem:[#allocation2 + $0x238] sm:$0xff]  ;;  %v212_v3 = vld [vmem:[#allocation2 + $0x520] sm:$0xff] }
  0x89   :  { %778 = vmatpush.msrb.mxu3 %v397_v4  ;;  %643 = vmatmul.f32.vlgmr.msra.gmra.mxu0 %v1062_v5  ;;  %v65_v4 = vld [vmem:[#allocation2 + $0x88] sm:$0xff] }
  0x8a   :  { %703 = vmatmul.f32.vlgmr.msra.gmra.mxu3 %v1065_v6  ;;  %719 = vmatpush.msrb.mxu0 %v250_v7  ;;  %v158_v7 = vld [vmem:[#allocation2 + $0x370] sm:$0xff] }
  0x8b   :  { %738 = vmatpush.msrb.mxu1 %v301_v8  ;;  %760 = vmatpush.msrb.mxu2 %v343_v9  ;;  %v116_v8 = vld [vmem:[#allocation2 + $0x220] sm:$0xff]  ;;  %v209_v9 = vld [vmem:[#allocation2 + $0x508] sm:$0xff] }
  0x8c   :  { %779 = vmatpush.msrb.mxu3 %v394_v10  ;;  %663 = vmatmul.f32.vlgmr.msra.gmra.mxu1 %v1069_v12  ;;  %v62_v10 = vld [vmem:[#allocation2 + $0x70] sm:$0xff] }
  0x8d   :  { %720 = vmatpush.msrb.mxu0 %v247_v11  ;;  %739 = vmatpush.msrb.mxu1 %v298_v13  ;;  %v155_v11 = vld [vmem:[#allocation2 + $0x358] sm:$0xff]  ;;  %v113_v13 = vld [vmem:[#allocation2 + $0x208] sm:$0xff] }
  0x8e   :  { %761 = vmatpush.msrb.mxu2 %v340_v14  ;;  %780 = vmatpush.msrb.mxu3 %v391_v15  ;;  %v206_v14 = vld [vmem:[#allocation2 + $0x4f0] sm:$0xff]  ;;  %v59_v15 = vld [vmem:[#allocation2 + $0x58] sm:$0xff] }
  0x8f   :  { %721 = vmatpush.msrb.mxu0 %v244_v0  ;;  %740 = vmatpush.msrb.mxu1 %v295_v16  ;;  %v152_v0 = vld [vmem:[#allocation2 + $0x340] sm:$0xff]  ;;  %v110_v16 = vld [vmem:[#allocation2 + $0x1f0] sm:$0xff] }
  0x90   :  { %762 = vmatpush.msrb.mxu2 %v337_v17  ;;  %781 = vmatpush.msrb.mxu3 %v388_v18  ;;  %v203_v17 = vld [vmem:[#allocation2 + $0x4d8] sm:$0xff]  ;;  %v56_v18 = vld [vmem:[#allocation2 + $0x40] sm:$0xff] }
  0x91   :  { %763 = vmatmul.f32.vlgmr.msrb.gmra.mxu2 %v1072_v20  ;;  %722 = vmatpush.msrb.mxu0 %v241_v19  ;;  %v149_v19 = vld [vmem:[#allocation2 + $0x328] sm:$0xff] }
  0x92   :  { %827 = vmatpush.msra.mxu2 %v191_v21  ;;  %741 = vmatpush.msrb.mxu1 %v292_v22  ;;  %v107_v21 = vld [vmem:[#allocation2 + $0x1d8] sm:$0xff]  ;;  %v200_v22 = vld [vmem:[#allocation2 + $0x4c0] sm:$0xff] }
  0x93   :  { %782 = vmatpush.msrb.mxu3 %v385_v23  ;;  %723 = vmatmul.f32.vlgmr.msrb.gmra.mxu0 %v1074_v25  ;;  %v53_v23 = vld [vmem:[#allocation2 + $0x28] sm:$0xff] }
  0x94   :  { %783 = vmatmul.f32.vlgmr.msrb.gmra.mxu3 %v1077_v26  ;;  %787 = vmatpush.msra.mxu0 %v95_v24  ;;  %v146_v24 = vld [vmem:[#allocation2 + $0x310] sm:$0xff] }
  0x95   :  { %828 = vmatpush.msra.mxu2 %v188_v27  ;;  %847 = vmatpush.msra.mxu3 %v239_v28  ;;  %v104_v27 = vld [vmem:[#allocation2 + $0x1c0] sm:$0xff]  ;;  %v197_v28 = vld [vmem:[#allocation2 + $0x4a8] sm:$0xff] }
  0x96   :  { %742 = vmatpush.msrb.mxu1 %v289_v29  ;;  %788 = vmatpush.msra.mxu0 %v92_v30  ;;  %v383_v29 = vld [vmem:[#allocation2 + $0xa78] sm:$0xff]  ;;  %v50_v30 = vld [vmem:[#allocation2 + $0x10] sm:$0xff] }
  0x97   :  { %743 = vmatmul.f32.vlgmr.msrb.gmra.mxu1 %v1080_v31  ;;  %829 = vmatpush.msra.mxu2 %v185_v32  ;;  %v101_v32 = vld [vmem:[#allocation2 + $0x1a8] sm:$0xff] }
  0x98   :  { %807 = vmatpush.msra.mxu1 %v143_v33  ;;  %848 = vmatpush.msra.mxu3 %v236_v34  ;;  %v194_v33 = vld [vmem:[#allocation2 + $0x490] sm:$0xff]  ;;  %v287_v34 = vld [vmem:[#allocation2 + $0x778] sm:$0xff] }
  0x99   :  { %789 = vmatpush.msra.mxu0 %v89_v35  ;;  %830 = vmatpush.msra.mxu2 %v182_v36  ;;  %v380_v35 = vld [vmem:[#allocation2 + $0xa60] sm:$0xff]  ;;  %v431_v36 = vld [vmem:[#allocation2 + $0xbf8] sm:$0xff] }
  0x9a   :  { %808 = vmatpush.msra.mxu1 %v140_v37  ;;  %849 = vmatpush.msra.mxu3 %v233_v38  ;;  %v98_v37 = vld [vmem:[#allocation2 + $0x190] sm:$0xff]  ;;  %v284_v38 = vld [vmem:[#allocation2 + $0x760] sm:$0xff] }
  0x9b   :  { %790 = vmatpush.msra.mxu0 %v86_v39  ;;  %831 = vmatpush.msra.mxu2 %v179_v40  ;;  %v335_v39 = vld [vmem:[#allocation2 + $0x8f8] sm:$0xff]  ;;  %v377_v40 = vld [vmem:[#allocation2 + $0xa48] sm:$0xff] }
  0x9c   :  { %809 = vmatpush.msra.mxu1 %v137_v41  ;;  %850 = vmatpush.msra.mxu3 %v230_v42  ;;  %v428_v41 = vld [vmem:[#allocation2 + $0xbe0] sm:$0xff]  ;;  %v281_v42 = vld [vmem:[#allocation2 + $0x748] sm:$0xff] }
  0x9d   :  { %791 = vmatpush.msra.mxu0 %v83_v43  ;;  %832 = vmatpush.msra.mxu2 %v176_v44  ;;  %v332_v43 = vld [vmem:[#allocation2 + $0x8e0] sm:$0xff]  ;;  %v374_v44 = vld [vmem:[#allocation2 + $0xa30] sm:$0xff] }
  0x9e   :  { %810 = vmatpush.msra.mxu1 %v134_v45  ;;  %851 = vmatpush.msra.mxu3 %v227_v46  ;;  %v425_v45 = vld [vmem:[#allocation2 + $0xbc8] sm:$0xff]  ;;  %v278_v46 = vld [vmem:[#allocation2 + $0x730] sm:$0xff] }
  0x9f   :  { %792 = vmatpush.msra.mxu0 %v80_v47  ;;  %833 = vmatpush.msra.mxu2 %v173_v48  ;;  %v329_v47 = vld [vmem:[#allocation2 + $0x8c8] sm:$0xff]  ;;  %v371_v48 = vld [vmem:[#allocation2 + $0xa18] sm:$0xff] }
  0xa0   :  { %811 = vmatpush.msra.mxu1 %v131_v49  ;;  %852 = vmatpush.msra.mxu3 %v224_v50  ;;  %v422_v49 = vld [vmem:[#allocation2 + $0xbb0] sm:$0xff]  ;;  %v275_v50 = vld [vmem:[#allocation2 + $0x718] sm:$0xff] }
  0xa1   :  { %793 = vmatpush.msra.mxu0 %v77_v51  ;;  %834 = vmatpush.msra.mxu2 %v170_v52  ;;  %v326_v51 = vld [vmem:[#allocation2 + $0x8b0] sm:$0xff]  ;;  %v368_v52 = vld [vmem:[#allocation2 + $0xa00] sm:$0xff] }
  0xa2   :  { %812 = vmatpush.msra.mxu1 %v128_v53  ;;  %853 = vmatpush.msra.mxu3 %v221_v54  ;;  %v419_v53 = vld [vmem:[#allocation2 + $0xb98] sm:$0xff]  ;;  %v272_v54 = vld [vmem:[#allocation2 + $0x700] sm:$0xff] }
  0xa3   :  { %794 = vmatpush.msra.mxu0 %v74_v55  ;;  %835 = vmatpush.msra.mxu2 %v167_v56  ;;  %v323_v55 = vld [vmem:[#allocation2 + $0x898] sm:$0xff]  ;;  %v365_v56 = vld [vmem:[#allocation2 + $0x9e8] sm:$0xff] }
  0xa4   :  { %813 = vmatpush.msra.mxu1 %v125_v57  ;;  %854 = vmatpush.msra.mxu3 %v218_v58  ;;  %v416_v57 = vld [vmem:[#allocation2 + $0xb80] sm:$0xff]  ;;  %v269_v58 = vld [vmem:[#allocation2 + $0x6e8] sm:$0xff] }
  0xa5   :  { %795 = vmatpush.msra.mxu0 %v71_v59  ;;  %836 = vmatpush.msra.mxu2 %v164_v60  ;;  %v320_v59 = vld [vmem:[#allocation2 + $0x880] sm:$0xff]  ;;  %v362_v60 = vld [vmem:[#allocation2 + $0x9d0] sm:$0xff] }
  0xa6   :  { %814 = vmatpush.msra.mxu1 %v122_v61  ;;  %855 = vmatpush.msra.mxu3 %v215_v62  ;;  %v413_v61 = vld [vmem:[#allocation2 + $0xb68] sm:$0xff]  ;;  %v266_v62 = vld [vmem:[#allocation2 + $0x6d0] sm:$0xff] }
  0xa7   :  { %796 = vmatpush.msra.mxu0 %v68_v63  ;;  %837 = vmatpush.msra.mxu2 %v161_v1  ;;  %v317_v63 = vld [vmem:[#allocation2 + $0x868] sm:$0xff]  ;;  %v359_v1 = vld [vmem:[#allocation2 + $0x9b8] sm:$0xff] }
  0xa8   :  { %815 = vmatpush.msra.mxu1 %v119_v2  ;;  %856 = vmatpush.msra.mxu3 %v212_v3  ;;  %v410_v2 = vld [vmem:[#allocation2 + $0xb50] sm:$0xff]  ;;  %v263_v3 = vld [vmem:[#allocation2 + $0x6b8] sm:$0xff] }
  0xa9   :  { %797 = vmatpush.msra.mxu0 %v65_v4  ;;  %838 = vmatpush.msra.mxu2 %v158_v7  ;;  %v314_v4 = vld [vmem:[#allocation2 + $0x850] sm:$0xff]  ;;  %v356_v7 = vld [vmem:[#allocation2 + $0x9a0] sm:$0xff] }
  0xaa   :  { %816 = vmatpush.msra.mxu1 %v116_v8  ;;  %857 = vmatpush.msra.mxu3 %v209_v9  ;;  %v407_v8 = vld [vmem:[#allocation2 + $0xb38] sm:$0xff]  ;;  %v260_v9 = vld [vmem:[#allocation2 + $0x6a0] sm:$0xff] }
  0xab   :  { %798 = vmatpush.msra.mxu0 %v62_v10  ;;  %839 = vmatpush.msra.mxu2 %v155_v11  ;;  %v311_v10 = vld [vmem:[#allocation2 + $0x838] sm:$0xff]  ;;  %v353_v11 = vld [vmem:[#allocation2 + $0x988] sm:$0xff] }
  0xac   :  { %817 = vmatpush.msra.mxu1 %v113_v13  ;;  %858 = vmatpush.msra.mxu3 %v206_v14  ;;  %v404_v13 = vld [vmem:[#allocation2 + $0xb20] sm:$0xff]  ;;  %v257_v14 = vld [vmem:[#allocation2 + $0x688] sm:$0xff] }
  0xad   :  { %799 = vmatpush.msra.mxu0 %v59_v15  ;;  %840 = vmatpush.msra.mxu2 %v152_v0  ;;  %v308_v15 = vld [vmem:[#allocation2 + $0x820] sm:$0xff]  ;;  %v350_v0 = vld [vmem:[#allocation2 + $0x970] sm:$0xff] }
  0xae   :  { %818 = vmatpush.msra.mxu1 %v110_v16  ;;  %859 = vmatpush.msra.mxu3 %v203_v17  ;;  %v401_v16 = vld [vmem:[#allocation2 + $0xb08] sm:$0xff]  ;;  %v254_v17 = vld [vmem:[#allocation2 + $0x670] sm:$0xff] }
  0xaf   :  { %800 = vmatpush.msra.mxu0 %v56_v18  ;;  %841 = vmatpush.msra.mxu2 %v149_v19  ;;  %v305_v18 = vld [vmem:[#allocation2 + $0x808] sm:$0xff]  ;;  %v347_v19 = vld [vmem:[#allocation2 + $0x958] sm:$0xff] }
  0xb0   :  { %819 = vmatpush.msra.mxu1 %v107_v21  ;;  %860 = vmatpush.msra.mxu3 %v200_v22  ;;  %v398_v21 = vld [vmem:[#allocation2 + $0xaf0] sm:$0xff]  ;;  %v965_v22 = vld.sshfl [vmem:[#allocation1 + $0x10] sm:$0xff pattern:$0x75316420] }
  0xb1   :  { %801 = vmatpush.msra.mxu0 %v53_v23  ;;  %842 = vmatpush.msra.mxu2 %v146_v24  ;;  %v251_v23 = vld [vmem:[#allocation2 + $0x658] sm:$0xff]  ;;  %v302_v24 = vld [vmem:[#allocation2 + $0x7f0] sm:$0xff] }
  0xb2   :  { %820 = vmatpush.msra.mxu1 %v104_v27  ;;  %861 = vmatpush.msra.mxu3 %v197_v28  ;;  %v344_v27 = vld [vmem:[#allocation2 + $0x940] sm:$0xff]  ;;  %v395_v28 = vld [vmem:[#allocation2 + $0xad8] sm:$0xff] }
  0xb3   :  { %907 = vmatpush.msrb.mxu2 %v383_v29  ;;  %802 = vmatpush.msra.mxu0 %v50_v30  ;;  %v248_v29 = vld [vmem:[#allocation2 + $0x640] sm:$0xff]  ;;  %v299_v30 = vld [vmem:[#allocation2 + $0x7d8] sm:$0xff] }
  0xb4   :  { %821 = vmatpush.msra.mxu1 %v101_v32  ;;  %862 = vmatpush.msra.mxu3 %v194_v33  ;;  %v341_v32 = vld [vmem:[#allocation2 + $0x928] sm:$0xff]  ;;  %v392_v33 = vld [vmem:[#allocation2 + $0xac0] sm:$0xff] }
  0xb5   :  { %867 = vmatpush.msrb.mxu0 %v287_v34  ;;  %908 = vmatpush.msrb.mxu2 %v380_v35  ;;  %v245_v34 = vld [vmem:[#allocation2 + $0x628] sm:$0xff]  ;;  %v296_v35 = vld [vmem:[#allocation2 + $0x7c0] sm:$0xff] }
  0xb6   :  { %927 = vmatpush.msrb.mxu3 %v431_v36  ;;  %822 = vmatpush.msra.mxu1 %v98_v37  ;;  %v338_v36 = vld [vmem:[#allocation2 + $0x910] sm:$0xff]  ;;  %v389_v37 = vld [vmem:[#allocation2 + $0xaa8] sm:$0xff] }
  0xb7   :  { %868 = vmatpush.msrb.mxu0 %v284_v38  ;;  %909 = vmatpush.msrb.mxu2 %v377_v40  ;;  %v386_v38 = vld [vmem:[#allocation2 + $0xa90] sm:$0xff] }
  0xb8   :  { %887 = vmatpush.msrb.mxu1 %v335_v39  ;;  %928 = vmatpush.msrb.mxu3 %v428_v41  ;;  %v290_v39 = vld [vmem:[#allocation2 + $0x790] sm:$0xff]  ;;  %v432_v41 = vld [vmem:[#allocation4] sm:$0x7] }
  0xb9   :  { %869 = vmatpush.msrb.mxu0 %v281_v42  ;;  %910 = vmatpush.msrb.mxu2 %v374_v44 }
  0xba   :  { %888 = vmatpush.msrb.mxu1 %v332_v43  ;;  %929 = vmatpush.msrb.mxu3 %v425_v45  ;;  %v434_v43 = vperm.slane %v432_v41, 0 }
  0xbb   :  { %870 = vmatpush.msrb.mxu0 %v278_v46  ;;  %911 = vmatpush.msrb.mxu2 %v371_v48 }
  0xbc   :  { %889 = vmatpush.msrb.mxu1 %v329_v47  ;;  %930 = vmatpush.msrb.mxu3 %v422_v49  ;;  %v435_v49 = vperm.slane %v432_v41, 1 }
  0xbd   :  { %871 = vmatpush.msrb.mxu0 %v275_v50  ;;  %912 = vmatpush.msrb.mxu2 %v368_v52 }
  0xbe   :  { %890 = vmatpush.msrb.mxu1 %v326_v51  ;;  %931 = vmatpush.msrb.mxu3 %v419_v53 }
  0xbf   :  { %872 = vmatpush.msrb.mxu0 %v272_v54  ;;  %913 = vmatpush.msrb.mxu2 %v365_v56 }
  0xc0   :  { %891 = vmatpush.msrb.mxu1 %v323_v55  ;;  %932 = vmatpush.msrb.mxu3 %v416_v57 }
  0xc1   :  { %873 = vmatpush.msrb.mxu0 %v269_v58  ;;  %914 = vmatpush.msrb.mxu2 %v362_v60 }
  0xc2   :  { %892 = vmatpush.msrb.mxu1 %v320_v59  ;;  %933 = vmatpush.msrb.mxu3 %v413_v61 }
  0xc3   :  { %874 = vmatpush.msrb.mxu0 %v266_v62  ;;  %915 = vmatpush.msrb.mxu2 %v359_v1 }
  0xc4   :  { %893 = vmatpush.msrb.mxu1 %v317_v63  ;;  %934 = vmatpush.msrb.mxu3 %v410_v2 }
  0xc5   :  { %875 = vmatpush.msrb.mxu0 %v263_v3  ;;  %916 = vmatpush.msrb.mxu2 %v356_v7 }
  0xc6   :  { %894 = vmatpush.msrb.mxu1 %v314_v4  ;;  %935 = vmatpush.msrb.mxu3 %v407_v8 }
  0xc7   :  { %876 = vmatpush.msrb.mxu0 %v260_v9  ;;  %917 = vmatpush.msrb.mxu2 %v353_v11  ;;  %v436_v11 = vperm.slane %v432_v41, 2 }
  0xc8   :  { %895 = vmatpush.msrb.mxu1 %v311_v10  ;;  %936 = vmatpush.msrb.mxu3 %v404_v13 }
  0xc9   :  { %877 = vmatpush.msrb.mxu0 %v257_v14  ;;  %918 = vmatpush.msrb.mxu2 %v350_v0 }
  0xca   :  { %896 = vmatpush.msrb.mxu1 %v308_v15  ;;  %937 = vmatpush.msrb.mxu3 %v401_v16 }
  0xcb   :  { %843 = vmatmul.f32.vlgmr.msra.gmra.mxu2 %v965_v22  ;;  %878 = vmatpush.msrb.mxu0 %v254_v17 }
  0xcc   :  { %897 = vmatpush.msrb.mxu1 %v305_v18  ;;  %919 = vmatpush.msrb.mxu2 %v347_v19 }
  0xcd   :  { %938 = vmatpush.msrb.mxu3 %v398_v21  ;;  %803 = vmatmul.f32.vlgmr.msra.gmra.mxu0 %v1062_v5  ;;  %v242_v5 = vld [vmem:[#allocation2 + $0x610] sm:$0xff] }
  0xce   :  { %863 = vmatmul.f32.vlgmr.msra.gmra.mxu3 %v1065_v6  ;;  %879 = vmatpush.msrb.mxu0 %v251_v23  ;;  %v293_v6 = vld [vmem:[#allocation2 + $0x7a8] sm:$0xff]  ;;  %v504_v40 = vpop.f32.mrf.mxu1  ;;  %v524_v42 = vpop.f32.mrf.mxu2 }
  0xcf   :  { %898 = vmatpush.msrb.mxu1 %v302_v24  ;;  %920 = vmatpush.msrb.mxu2 %v344_v27 }
  0xd0   :  { %939 = vmatpush.msrb.mxu3 %v395_v28  ;;  %823 = vmatmul.f32.vlgmr.msra.gmra.mxu1 %v1069_v12  ;;  %v484_v12 = vpop.f32.mrf.mxu0 }
  0xd1   :  { %880 = vmatpush.msrb.mxu0 %v248_v29  ;;  %899 = vmatpush.msrb.mxu1 %v299_v30  ;;  %v544_v44 = vpop.f32.mrf.mxu3  ;;  %v485_v46 = vadd.f32 %v484_v12, %v434_v43 }
  0xd2   :  { %921 = vmatpush.msrb.mxu2 %v341_v32  ;;  %940 = vmatpush.msrb.mxu3 %v392_v33 }
  0xd3   :  { %881 = vmatpush.msrb.mxu0 %v245_v34  ;;  %900 = vmatpush.msrb.mxu1 %v296_v35  ;;  %v505_v48 = vadd.f32 %v504_v40, %v485_v46 }
  0xd4   :  { %922 = vmatpush.msrb.mxu2 %v338_v36  ;;  %941 = vmatpush.msrb.mxu3 %v389_v37 }
  0xd5   :  { %923 = vmatmul.f32.vlgmr.msrb.gmra.mxu2 %v1072_v20  ;;  %882 = vmatpush.msrb.mxu0 %v242_v5 }
  0xd6   :  { %901 = vmatpush.msrb.mxu1 %v293_v6  ;;  %942 = vmatpush.msrb.mxu3 %v386_v38 }
  0xd7   :  { %883 = vmatmul.f32.vlgmr.msrb.gmra.mxu0 %v1074_v25  ;;  %943 = vmatmul.f32.vlgmr.msrb.gmra.mxu3 %v1077_v26  ;;  %v584_v20 = vpop.f32.mrf.mxu1  ;;  %v525_v25 = vadd.f32 %v524_v42, %v505_v48 }
  0xd8   :  { %902 = vmatpush.msrb.mxu1 %v290_v39  ;;  %v564_v45 = vpop.f32.mrf.mxu0  ;;  %v604_v47 = vpop.f32.mrf.mxu2 }
  0xd9   :  { %903 = vmatmul.f32.vlgmr.msrb.gmra.mxu1 %v1080_v31  ;;  %v545_v31 = vadd.f32 %v544_v44, %v525_v25 }
  0xdb   :  { %v624_v50 = vpop.f32.mrf.mxu3  ;;  %v565_v58 = vadd.f32 %v564_v45, %v545_v31 }
  0xdd   :  { %v585_v61 = vadd.f32 %v584_v20, %v565_v58 }
  0xdf   :  { %v605_v2 = vadd.f32 %v604_v47, %v585_v61 }
  0xe1   :  { %v625_v8 = vadd.f32 %v624_v50, %v605_v2 }
 0x106   :  { %v644_v51 = vpop.f32.mrf.mxu0 }
 0x107   :  { %v645_v52 = vadd.f32 %v644_v51, %v435_v49 }
 0x109   :  { %v664_v26 = vpop.f32.mrf.mxu1 }
 0x10a   :  { %v665_v53 = vadd.f32 %v664_v26, %v645_v52  ;;  %v684_v54 = vpop.f32.mrf.mxu2 }
 0x10c   :  { %v685_v55 = vadd.f32 %v684_v54, %v665_v53 }
 0x10d   :  { %v704_v56 = vpop.f32.mrf.mxu3 }
 0x10e   :  { %v705_v57 = vadd.f32 %v704_v56, %v685_v55 }
 0x110   :  { %v724_v59 = vpop.f32.mrf.mxu0 }
 0x111   :  { %v725_v60 = vadd.f32 %v724_v59, %v705_v57 }
 0x114   :  { %v744_v62 = vpop.f32.mrf.mxu1  ;;  %v764_v63 = vpop.f32.mrf.mxu2 }
 0x115   :  { %v745_v1 = vadd.f32 %v744_v62, %v725_v60 }
 0x117   :  { %v765_v3 = vadd.f32 %v764_v63, %v745_v1  ;;  %v784_v4 = vpop.f32.mrf.mxu3 }
 0x119   :  { %v785_v7 = vadd.f32 %v784_v4, %v765_v3 }
 0x11b   :  { %v949_v9 = vrot.slane %v785_v7, 4 }
 0x11d   :  { %v951_v10 = vsel %vm950_vm0, %v625_v8, %v949_v9 }
 0x11e   :  { %953 = vst [vmem:[%s1108_s3] sm:$0xff] %v951_v10 }
 0x14a   :  { %v804_v13 = vpop.f32.mrf.mxu0 }
 0x14b   :  { %v805_v14 = vadd.f32 %v804_v13, %v436_v11 }
 0x14d   :  { %v824_v15 = vpop.f32.mrf.mxu1 }
 0x14e   :  { %v825_v0 = vadd.f32 %v824_v15, %v805_v14  ;;  %v844_v16 = vpop.f32.mrf.mxu2 }
 0x150   :  { %v845_v17 = vadd.f32 %v844_v16, %v825_v0 }
 0x151   :  { %v864_v18 = vpop.f32.mrf.mxu3 }
 0x152   :  { %v865_v19 = vadd.f32 %v864_v18, %v845_v17 }
 0x154   :  { %v884_v21 = vpop.f32.mrf.mxu0 }
 0x155   :  { %v885_v22 = vadd.f32 %v884_v21, %v865_v19 }
 0x156   :  { %v904_v23 = vpop.f32.mrf.mxu1 }
 0x157   :  { %v905_v24 = vadd.f32 %v904_v23, %v885_v22 }
 0x158   :  { %v924_v27 = vpop.f32.mrf.mxu2 }
 0x159   :  { %v925_v28 = vadd.f32 %v924_v27, %v905_v24 }
 0x15a   :  { %v944_v29 = vpop.f32.mrf.mxu3 }
 0x15b   :  { %v945_v30 = vadd.f32 %v944_v29, %v925_v28 }
 0x15d   :  { %954 = vst [vmem:[%s1108_s3 + $0x8] sm:$0xf] %v945_v30 }
 0x15e   :  { %959 = vsyncpa [#allocation3], 1 }
 0x15f   :  { %960 = vsyncpa [#allocation5], 1 }

</bundles_post_ra>
